<compile_context>
chip_gen: v7x
topology: tpu7x:2x2x1
jax: 0.10.0
libtpu: 0.0.40
codegen_flags: <defaults>
</compile_context>

<pallas_src>
import functools

import jax
import jax.numpy as jnp
import numpy as np
from jax.experimental import pallas as pl
from jax.experimental.pallas import tpu as pltpu

_LANES = 512                 # lane width of the dense parameter view
_TARGET_TILE_BYTES = 8 << 20 # target useful bytes per grid step


def _round_up(x, m):
    return ((x + m - 1) // m) * m


def _cdiv(a, b):
    return (a + b - 1) // b


def _vmem_capacity_bytes():
    try:
        return int(pltpu.get_tpu_info().vmem_capacity_bytes)
    except Exception:
        return 64 << 20      # conservative fallback (v7x per-core VMEM)


def _num_tensorcores():
    """Best-effort TensorCore count; v5e/v6e are 1, v7x is 2 per chip."""
    try:
        info = pltpu.get_tpu_info()
        for name in ("num_cores", "core_count", "num_tensorcores",
                     "tensorcores_per_chip"):
            v = getattr(info, name, None)
            if v:
                return max(1, int(v))
    except Exception:
        pass
    return 1


# ---------------------------------------------------------------------------
# Streaming per-task sum-of-squares over the (dense, zero-padded) param axis.
# ---------------------------------------------------------------------------
def _sumsq_kernel(g_ref, acc_ref):
    """g_ref: (T, tile_rows, L) dense tile.  acc_ref: (1, T, 8, L) resident
    output block, accumulated across the reduction (k) axis of the grid."""
    k = pl.program_id(1)

    @pl.when(k == 0)
    def _():
        acc_ref[...] = jnp.zeros_like(acc_ref)

    t, tile_rows, lanes = g_ref.shape
    n_rb = tile_rows // 8

    # Steady-state inner loop: load an 8-sublane dense slab per task, square,
    # accumulate in f32.  No masking anywhere (padded zeros contribute zero).
    def body(r, carry):
        off = pl.multiple_of(r * 8, 8)
        g = g_ref[:, pl.ds(off, 8), :].astype(jnp.float32)   # (T, 8, L)
        return carry + g * g

    carry = jax.lax.fori_loop(0, n_rb, body,
                              jnp.zeros((t, 8, lanes), jnp.float32),
                              unroll=min(8, n_rb))
    acc_ref[...] += carry[None]       # single VMEM accumulate per grid step


# ---------------------------------------------------------------------------
# Wrapper (module forward).
# ---------------------------------------------------------------------------
def gradnorm_forward(losses, initial_losses, weights, grads_flat, *,
                     alpha=1.5, weight_loss_gn=0.1,
                     n_par=None, max_tile_rows=None, lanes=_LANES):
    """GradNormLossBalancer.forward -> (total_loss, gradnorm_loss) scalars.

    losses, initial_losses, weights: (task_num,) f32.
    grads_flat: (task_num, P) per-task flattened grads of the shared params in
        their native dtype (f32 or bf16 -- bf16 halves HBM traffic; the kernel
        accumulates in f32 either way).
    """
    task_num = int(losses.shape[0])
    P = int(grads_flat.shape[-1])
    itemsize = int(jnp.dtype(grads_flat.dtype).itemsize)

    if initial_losses is None:        # module caches first-call losses
        initial_losses = jax.lax.stop_gradient(losses)

    # --- dense tile geometry (VMEM-capacity aware; exact, no sublane pad) ----
    vmem_cap = _vmem_capacity_bytes()
    r_min = _cdiv(P, lanes)                                    # rows needed
    max_tile_bytes = min(_TARGET_TILE_BYTES, vmem_cap // 6)    # 2 bufs + slack
    tile_rows = (max_tile_bytes // (task_num * lanes * itemsize)) // 8 * 8
    tile_rows = max(8, min(tile_rows, _round_up(r_min, 8)))
    if max_tile_rows is not None:
        tile_rows = max(8, min(tile_rows, (int(max_tile_rows) // 8) * 8))

    tiles_min = _cdiv(r_min, tile_rows)
    if n_par is None:
        n_par = _num_tensorcores()     # 1 on v5e/v6e; 2 on v7x
    n_slices = max(1, min(int(n_par), tiles_min))
    tiles_per_slice = _cdiv(tiles_min, n_slices)
    tiles_total = tiles_per_slice * n_slices
    r_total = tiles_total * tile_rows
    p_pad = r_total * lanes

    # Dense (T, R, L) view.  The reshape is free when P already matches the
    # tile footprint; otherwise a single zero-pad copy is made (zeros add
    # nothing to the sum of squares, so no in-kernel masking is ever needed).
    # TODO(synk): callers that build grads_flat by concatenating per-param
    # grads can write straight into the padded (T, r_total, lanes) buffer to
    # make this zero-copy (and keep the grads bf16 end-to-end).
    g = grads_flat
    if p_pad != P:
        g = jnp.pad(g, ((0, 0), (0, p_pad - P)))
    g3 = g.reshape(task_num, r_total, lanes)

    tile_bytes = task_num * tile_rows * lanes * itemsize       # exact (dense)
    vmem_need = 2 * tile_bytes + 2 * task_num * 8 * lanes * 4 + (1 << 20)
    vmem_limit_bytes = int(min(vmem_cap * 7 // 8, max(32 << 20, vmem_need)))

    partials = pl.pallas_call(
        _sumsq_kernel,
        out_shape=jax.ShapeDtypeStruct((n_slices, task_num, 8, lanes),
                                       jnp.float32),
        grid_spec=pltpu.PrefetchScalarGridSpec(
            num_scalar_prefetch=0,
            grid=(n_slices, tiles_per_slice),
            in_specs=[pl.BlockSpec(
                (task_num, tile_rows, lanes),
                lambda i, k: (0, i * tiles_per_slice + k, 0))],
            out_specs=pl.BlockSpec(
                (1, task_num, 8, lanes), lambda i, k: (i, 0, 0, 0)),
        ),
        compiler_params=pltpu.CompilerParams(
            # Leading axis is meant to shard across TensorCores on v7x; on
            # single-TC chips n_slices is 1 so it is a no-op outer loop.
            dimension_semantics=("parallel", "arbitrary"),
            vmem_limit_bytes=vmem_limit_bytes),
    )(g3)

    # --- tiny GradNorm epilogue (a few hundred bytes) in plain jnp -----------
    losses = losses.astype(jnp.float32)
    initial_losses = initial_losses.astype(jnp.float32)
    weights = weights.astype(jnp.float32)

    sumsq = jnp.sum(partials, axis=(0, 2, 3))                  # (T,)
    grad_norms = jnp.sqrt(sumsq)
    total_loss = jnp.sum(weights * losses)
    # NOTE: inherits the reference behaviour that non-positive loss ratios
    # make inv_train_rate ** alpha NaN.
    ratios = losses / initial_losses
    inv_train_rate = jax.lax.stop_gradient(ratios / jnp.mean(ratios))
    mean_grad = jax.lax.stop_gradient(jnp.mean(grad_norms))
    target = mean_grad * inv_train_rate ** alpha
    gradnorm_loss = jnp.sum(jnp.abs(grad_norms - target)) * weight_loss_gn
    return total_loss, gradnorm_loss


def _reference(losses, initial_losses, weights, grads_flat, alpha, weight_loss_gn):
    total = jnp.sum(weights * losses)
    gnorms = jnp.sqrt(jnp.sum(grads_flat.astype(jnp.float32) ** 2, axis=1))
    ratios = losses / initial_losses
    inv_tr = ratios / jnp.mean(ratios)
    target = jnp.mean(gnorms) * inv_tr ** alpha
    gn = jnp.sum(jnp.abs(gnorms - target)) * weight_loss_gn
    return total, gn


if __name__ == "__main__":
    key = jax.random.PRNGKey(0)
    k1, k2, k3, k4 = jax.random.split(key, 4)

    task_num, alpha, weight_loss_gn = 3, 1.5, 0.1

    # Two shared parameter tensors -> P = 80*100 + 100*50 = 13000 flattened
    # elements.  P is not a multiple of the 512-lane tile width, so the run
    # exercises the zero-pad path, multi-tile accumulation and a 2-way slice
    # split (sequential on single-TC chips, cross-core on v7x).
    W1 = jax.random.normal(k1, (80, 100), jnp.float32) / jnp.sqrt(80.0)
    W2 = jax.random.normal(k2, (100, 50), jnp.float32) / jnp.sqrt(100.0)
    x = jax.random.normal(k3, (4, 80), jnp.float32)
    tgts = jax.random.normal(k4, (task_num, 4, 50), jnp.float32)

    def task_loss(params, i):
        w1, w2 = params
        y = x @ w1 @ w2
        return jnp.mean((y - tgts[i]) ** 2) * (0.5 + 0.5 * i)

    # TODO(synk): torch.autograd.grad(..., create_graph=True) has no in-kernel
    # equivalent; the per-task grads of the shared params come from jax.grad.
    losses = jnp.stack([task_loss((W1, W2), i) for i in range(task_num)])
    grads_flat = jnp.stack([
        jnp.concatenate([g.reshape(-1) for g in
                         jax.grad(functools.partial(task_loss, i=i))((W1, W2))])
        for i in range(task_num)])                             # (T, 13000)

    weights = jnp.ones((task_num,), jnp.float32)     # nn.Parameter(ones) init
    # Module stores initial_losses on the first call; simulate a later step.
    initial_losses = losses * jnp.array([1.2, 0.9, 1.1], jnp.float32)

    # Small tiles + 2 slices to exercise the full grid structure in the demo
    # (real sizes use the VMEM-derived ~8 MiB tiles and the detected core count).
    total, gn = gradnorm_forward(losses, initial_losses, weights, grads_flat,
                                 alpha=alpha, weight_loss_gn=weight_loss_gn,
                                 n_par=2, max_tile_rows=8)
    jax.block_until_ready((total, gn))

    ref_total, ref_gn = _reference(losses, initial_losses, weights, grads_flat,
                                   alpha, weight_loss_gn)
    assert np.allclose(float(total), float(ref_total), rtol=1e-5, atol=1e-5), \
        (float(total), float(ref_total))
    assert np.allclose(float(gn), float(ref_gn), rtol=1e-5, atol=1e-5), \
        (float(gn), float(ref_gn))

    # bf16 grads end-to-end (the intended production dtype): kernel casts and
    # accumulates in f32; default (auto) tiling and core count.
    grads_bf16 = grads_flat.astype(jnp.bfloat16)
    total_bf, gn_bf = gradnorm_forward(losses, initial_losses, weights,
                                       grads_bf16, alpha=alpha,
                                       weight_loss_gn=weight_loss_gn)
    jax.block_until_ready((total_bf, gn_bf))
    ref_total_bf, ref_gn_bf = _reference(losses, initial_losses, weights,
                                         grads_bf16.astype(jnp.float32),
                                         alpha, weight_loss_gn)
    assert np.allclose(float(total_bf), float(ref_total_bf), rtol=1e-4, atol=1e-4), \
        (float(total_bf), float(ref_total_bf))
    assert np.allclose(float(gn_bf), float(ref_gn_bf), rtol=1e-4, atol=1e-4), \
        (float(gn_bf), float(ref_gn_bf))

    print("KERNEL_OK")
</pallas_src>

<mosaic_0001>
module attributes {stable_mosaic.version = 11 : i64} {
  func.func @_sumsq_kernel(%arg0: i32, %arg1: i32, %arg2: memref<3x8x512xf32, #tpu.memory_space<vmem>>, %arg3: memref<1x3x8x512xf32, #tpu.memory_space<vmem>>) attributes {dimension_semantics = [#tpu.dimension_semantics<parallel>, #tpu.dimension_semantics<arbitrary>], iteration_bounds = array<i64: 2, 2>, scalar_prefetch = 0 : i64, scratch_operands = 0 : i64, tpu.core_type = #tpu.core_type<tc>, window_params = [{transform_indices = @transform_0, window_bounds = array<i64: 3, 8, 512>}, {transform_indices = @transform_1, window_bounds = array<i64: 1, 3, 8, 512>}]} {
    %c0_i32 = arith.constant 0 : i32
    %0 = arith.cmpi eq, %arg1, %c0_i32 : i32
    %1 = arith.extui %0 : i1 to i32
    %c0_i32_0 = arith.constant 0 : i32
    %2 = arith.cmpi ne, %1, %c0_i32_0 : i32
    scf.if %2 {
      %cst_11 = arith.constant 0.000000e+00 : f32
      %14 = vector.broadcast %cst_11 : f32 to vector<1x3x8x512xf32>
      %c0_12 = arith.constant 0 : index
      %c0_13 = arith.constant 0 : index
      %c0_14 = arith.constant 0 : index
      %c0_15 = arith.constant 0 : index
      %15 = vector.load %arg3[%c0_12, %c0_13, %c0_14, %c0_15] : memref<1x3x8x512xf32, #tpu.memory_space<vmem>>, vector<1x3x8x512xf32>
      tpu.vector_store %arg3[%c0_12, %c0_13, %c0_14, %c0_15], %14 {strides = array<i32>} : memref<1x3x8x512xf32, #tpu.memory_space<vmem>>, vector<1x3x8x512xf32>,
    } else {
    }
    %cst = arith.constant 0.000000e+00 : f32
    %3 = vector.broadcast %cst : f32 to vector<3x8x512xf32>
    %c0_i32_1 = arith.constant 0 : i32
    %c8_i32 = arith.constant 8 : i32
    %4 = arith.muli %c0_i32_1, %c8_i32 : i32
    %5 = tpu.assume_multiple %4, 8 : i32
    %c0 = arith.constant 0 : index
    %6 = arith.index_cast %5 : i32 to index
    %c0_2 = arith.constant 0 : index
    %7 = vector.load %arg2[%c0, %6, %c0_2] : memref<3x8x512xf32, #tpu.memory_space<vmem>>, vector<3x8x512xf32>
    %8 = arith.mulf %7, %7 : vector<3x8x512xf32>
    %9 = arith.addf %3, %8 : vector<3x8x512xf32>
    %c1_i32 = arith.constant 1 : i32
    %c0_3 = arith.constant 0 : index
    %c0_4 = arith.constant 0 : index
    %c0_5 = arith.constant 0 : index
    %c0_6 = arith.constant 0 : index
    %10 = vector.load %arg3[%c0_3, %c0_4, %c0_5, %c0_6] : memref<1x3x8x512xf32, #tpu.memory_space<vmem>>, vector<1x3x8x512xf32>
    %11 = vector.shape_cast %9 : vector<3x8x512xf32> to vector<1x3x8x512xf32>
    %12 = arith.addf %10, %11 : vector<1x3x8x512xf32>
    %c0_7 = arith.constant 0 : index
    %c0_8 = arith.constant 0 : index
    %c0_9 = arith.constant 0 : index
    %c0_10 = arith.constant 0 : index
    %13 = vector.load %arg3[%c0_7, %c0_8, %c0_9, %c0_10] : memref<1x3x8x512xf32, #tpu.memory_space<vmem>>, vector<1x3x8x512xf32>
    tpu.vector_store %arg3[%c0_7, %c0_8, %c0_9, %c0_10], %12 {strides = array<i32>} : memref<1x3x8x512xf32, #tpu.memory_space<vmem>>, vector<1x3x8x512xf32>,
    return
  }
  func.func @transform_0(%arg0: i32, %arg1: i32) -> (i32, i32, i32) {
    %c2_i32 = arith.constant 2 : i32
    %0 = arith.muli %arg0, %c2_i32 : i32
    %1 = arith.addi %0, %arg1 : i32
    %c0_i32 = arith.constant 0 : i32
    %c0_i32_0 = arith.constant 0 : i32
    %c0_i32_1 = arith.constant 0 : i32
    return %c0_i32, %1, %c0_i32_0 : i32, i32, i32
  }
  func.func @transform_1(%arg0: i32, %arg1: i32) -> (i32, i32, i32, i32) {
    %c0_i32 = arith.constant 0 : i32
    %c0_i32_0 = arith.constant 0 : i32
    %c0_i32_1 = arith.constant 0 : i32
    %c0_i32_2 = arith.constant 0 : i32
    return %arg0, %c0_i32, %c0_i32_0, %c0_i32_1 : i32, i32, i32, i32
  }
}

</mosaic_0001>

<bundles_post_ra>
// kernel: tpu_custom_call.1
= control target key start
LH: loop header
LB: loop body
LE: loop exit
PB: predicated region body
PF: predicated region fallthrough
CT: control target
= control target key end

     0   :  { %6 = vsyncpa [#allocation3], 0  ;;  %s931_s0 = inlined_call_operand.hbm [shape: f32[3,32,512], index: 0, kind: input, shape index: {}]   ;;  %s932_s1 = inlined_call_operand.hbm [shape: f32[2,3,8,512], index: 1, kind: output, shape index: {}]  }
   0x1   :  { %8 = vsyncpa [#allocation3 + $0x1], 0 }
   0x2   :  { %9 = vsyncpa [#allocation4], 0 }
   0x3   :  { %11 = vsyncpa [#allocation4 + $0x1], 0  ;;  %s645_s6 = smov 0   ;;  %s647_s7 = smov 0  }
   0x4   :  { %s649_s8 = smov 0   ;;  %s651_s9 = smov 0  }
   0x5   :  { %s653_s10 = smov 0   ;;  %s655_s11 = smov 0  }
   0x6   :  { %s657_s12 = smov 0   ;;  %s659_s13 = smov 0  }
   0x7   :  { %s661_s14 = smov 0   ;;  %s663_s15 = smov 0  }
   0x8   :  { %s665_s16 = smov 0  }
   0x9 LB: > { %s346_s17 = sadd.s32 4294967295, %s625_s16   ;;  %s347_s18 = sadd.s32 4294967294, %s625_s16   ;;  %s625_s16 = sphi %s665_s16, %s17_s16   ;;  %s621_s15 = sphi %s663_s15, %s951_s15   ;;  %s617_s14 = sphi %s661_s14, %s950_s14   ;;  %s613_s13 = sphi %s659_s13, %s949_s13   ;;  %s609_s12 = sphi %s657_s12, %s948_s12   ;;  %s605_s11 = sphi %s655_s11, %s947_s11   ;;  %s601_s10 = sphi %s653_s10, %s946_s10   ;;  %s597_s9 = sphi %s651_s9, %s945_s9   ;;  %s593_s8 = sphi %s649_s8, %s944_s8   ;;  %s589_s7 = sphi %s647_s7, %s943_s7   ;;  %s585_s6 = sphi %s645_s6, %s942_s6  }
   0xa   : > { %s26_s19 = sadd.s32 1, %s617_s14  ;;  %s29_s20 = sadd.s32 1, %s621_s15 }
   0xb   : > { %p27_p0 = scmp.ge.s32.totalorder %s26_s19, 2  ;;  %s348_s21 = sshll.u32 %s621_s15, 1 }
   0xc   : > { %s704_s22 = sadd.s32 %s617_s14, %s348_s21  ;;  %s40_s23 = sadd.s32 1, %s605_s11 }
   0xd   : > { %s953_s19 = smov (%p27_p0, %s26_s19), 0  ;;  %s955_s20 = smov (!%p27_p0, %s29_s20), %s621_s15 }
   0xe   : > { %p47_p1 = scmp.ne.s32.totalorder %s605_s11, %s601_s10  ;;  %p48_p2 = scmp.eq.s32.totalorder %s625_s16, 0 }
   0xf   : > { %p31_p3 = scmp.ge.s32.totalorder %s955_s20, 2  ;;  %p53_p4 = scmp.ne.s32.totalorder %s601_s10, %s597_s9 }
  0x10   : > { %p714_p5 = por %p48_p2, %p47_p1  ;;  %p54_p6 = scmp.eq.s32.totalorder %s346_s17, 0 }
  0x11   : > { %s957_s20 = smov (%p31_p3, %s955_s20), 0  ;;  %s66_s26 = sadd.s32 1, %s593_s8 }
  0x12   : > { %p720_p7 = por %p54_p6, %p53_p4  ;;  %s349_s27 = sshll.u32 %s957_s20, 1 }
  0x13   : > { %s63_s28 = ssub.s32 %s621_s15, %s957_s20  ;;  %s36_s29 = sadd.s32 %s349_s27, %s953_s19 }
  0x14   : > { %p64_p8 = scmp.eq.s32.totalorder %s63_s28, 0  ;;  %s37_s30 = ssub.s32 %s704_s22, %s36_s29 }
  0x15   : > { %p76_p9 = scmp.ne.s32.totalorder %s593_s8, %s589_s7  ;;  %p38_p10 = scmp.eq.s32.totalorder %s37_s30, 0 }
  0x16   : > { %p77_p11 = scmp.eq.s32.totalorder %s346_s17, 3  ;;  %p82_p13 = scmp.ne.s32.totalorder %s589_s7, %s585_s6 }
  0x17   : > { %s733_s2 = scalar_select %p64_p8, %s593_s8, %s66_s26  }
  0x18   : > { %s736_s3 = scalar_select %p38_p10, %s605_s11, %s40_s23  }
  0x19   : > { %p738_p12 = por %p77_p11, %p76_p9  ;;  %p83_p0 = scmp.eq.s32.totalorder %s347_s18, 3 }
  0x1a   : > { %p377_p1 = scmp.lt.s32.totalorder %s625_s16, 4  ;;  %s103_s5 = sand.u32 1, %s605_s11  }
  0x1b   : > { %s936_s4 = scalar_select %p738_p12, 1, 0 }
  0x1c   : > { %p748_p2 = por %p83_p0, %p82_p13  ;;  %s361_s21 = smul.u32 96, %s103_s5 }
  0x1d   : > { %s360_s17 = sshll.u32 %s704_s22, 9  ;;  %p760_p3 = pnand %p377_p1, %p714_p5 }
  0x1e   : > { %s937_s9 = scalar_select %p748_p2, 1, 0 }
  0x1f   : > { %s756_s23 = scalar_lea.hbm %s931_s0, %s360_s17  ;;  %s107_s28 = scalar_lea.vmem [#allocation2], %s361_s21 }
  0x20   : > { %s116_s29 = sshll.u32 %s107_s28, 4  ;;  %s767_s22 = scalar_lea.sflag [#allocation3], %s103_s5  ;;  %s764_s29 = int_to_ptr.vmem [resolvable:$true] %s116_s29 }
  0x21   : > { %s473_s30 = scalar_lea.hbm %s756_s23, 1536  ;;  %p475_p8 = pneg %p760_p3 }
  0x22   : > { %p474_p6 = scmp.ne.s32.totalorder %s756_s23, %s473_s30  ;;  %s478_s27 = scalar_lea.hbm %s931_s0, 6144 }
  0x23   : > { %p479_p10 = scmp.lt.u32.totalorder %s756_s23, %s931_s0  ;;  %p480_p11 = scmp.lt.u32.totalorder %s478_s27, %s473_s30 }
  0x24   : > { %p476_p9 = pnand %p475_p8, %p474_p6  ;;  %p482_p0 = scmp.lt.u32.totalorder %s473_s30, %s756_s23 }
  0x25   : > { %p481_p13 = por %p480_p11, %p479_p10 }
  0x26   : > { %p477_p5 = pneg %p476_p9 }
  0x27   : > { %p483_p1 = por %p482_p0, %p481_p13 }
  0x29   : > { %p484_p4 = pnand %p483_p1, %p477_p5 }
  0x2b   : > { %487 = shalt.err (!%p484_p4)
}
  0x2c   : > { %s488_s5 = scalar_lea.vmem %s764_s29, 1536  ;;  %s627_s28 = smov [#allocation2]  }
  0x2d   : > { %p489_p6 = scmp.ne.s32.totalorder %s764_s29, %s488_s5  ;;  %s493_s24 = sshll.u32 %s627_s28, 4  ;;  %s494_s24 = int_to_ptr.vmem [resolvable:$false] %s493_s24 }
  0x2e   : > { %s495_s17 = scalar_lea.vmem %s494_s24, 3072  ;;  %p496_p12 = scmp.lt.s32.totalorder %s764_s29, %s494_s24 }
  0x2f   : > { %p491_p9 = pnand %p489_p6, %p475_p8  ;;  %p497_p10 = scmp.lt.s32.totalorder %s495_s17, %s488_s5 }
  0x31   : > { %p492_p2 = pneg %p491_p9  ;;  %p498_p11 = por %p497_p10, %p496_p12 }
  0x33   : > { %p499_p13 = pnand %p498_p11, %p492_p2 }
  0x35   : > { %502 = shalt.err (!%p499_p13)
}
  0x36   : > { %s628_s30 = smov 2048   ;;  %s629_s27 = smov 512  }
  0x37   : > { %s630_s26 = smov 32   ;;  %p124_p4 = scmp.lt.s32.totalorder %s625_s16, 5 }
  0x38   : > { %372 = dma.hbm_to_vmem [thread:$0]  (!%p760_p3), %s756_s23, 1536, %s764_s29, %s767_s22, %s628_s30, %s629_s27, %s630_s26  }
  0x39   : > { %p939_p8 = scmp.ge.s32.totalorder %s625_s16, 1 }
  0x3b   : > { %p125_p5 = pnand %p939_p8, %p124_p4 }
  0x3c   : > { %s130_s21 = sand.u32 (!%p125_p5), 1, %s601_s10  }
  0x3d   : > { %128 = sbr.rel (%p125_p5) target bundleno = 107 (0x6b), region = 24  ;;  %s131_s28 = scalar_lea.sflag (!%p125_p5), [#allocation3], %s130_s21 }
  0x3e   : > { %s362_s5 = smul.u32 (!%p125_p5), 96, %s130_s21 }
  0x40   : > { %s799_s24 = scalar_lea.vmem (!%p125_p5), [#allocation2], %s362_s5 }
  0x44   : > { %576 = dma.done.wait (%p720_p7), %s131_s28, 1536  }
  0x45   : > { %578 = vsyncadd (%p720_p7), %s131_s28, 4294965760  ;;  %s150_s18 = sand.u32 1, %s589_s7   ;;  %p356_p12 = scmp.ne.s32.totalorder %s609_s12, 0 }
  0x46   : > { %s363_s23 = smul.u32 96, %s150_s18  ;;  %v631_v0 = vmov (!%p356_p12), 0.0  }
  0x47   : > { %158 = sbr.rel (%p356_p12) target bundleno = 79 (0x4f), region = 32 }
  0x48   : > { %s808_s29 = scalar_lea.vmem [#allocation5], %s363_s23 }
  0x49   : > { %159 = vst [vmem:[%s808_s29] sm:$0xff] (!%p356_p12), %v631_v0  ;;  %160 = vst [vmem:[%s808_s29 + $0x8] sm:$0xff] (!%p356_p12), %v631_v0 }
  0x4a   : > { %161 = vst [vmem:[%s808_s29 + $0x10] sm:$0xff] (!%p356_p12), %v631_v0  ;;  %162 = vst [vmem:[%s808_s29 + $0x18] sm:$0xff] (!%p356_p12), %v631_v0 }
  0x4b   : > { %163 = vst [vmem:[%s808_s29 + $0x20] sm:$0xff] (!%p356_p12), %v631_v0  ;;  %164 = vst [vmem:[%s808_s29 + $0x28] sm:$0xff] (!%p356_p12), %v631_v0 }
  0x4c   : > { %165 = vst [vmem:[%s808_s29 + $0x30] sm:$0xff] (!%p356_p12), %v631_v0  ;;  %166 = vst [vmem:[%s808_s29 + $0x38] sm:$0xff] (!%p356_p12), %v631_v0 }
  0x4d   : > { %167 = vst [vmem:[%s808_s29 + $0x40] sm:$0xff] (!%p356_p12), %v631_v0  ;;  %168 = vst [vmem:[%s808_s29 + $0x48] sm:$0xff] (!%p356_p12), %v631_v0 }
  0x4e   : > { %169 = vst [vmem:[%s808_s29 + $0x50] sm:$0xff] %v631_v0  ;;  %170 = vst [vmem:[%s808_s29 + $0x58] sm:$0xff] %v631_v0 }
  0x4f PF: > { %v174_v1 = vld [vmem:[%s799_s24] sm:$0xff]  ;;  %v175_v3 = vld [vmem:[%s799_s24 + $0x8] sm:$0xff]  ;;  %v176_v7 = vld [vmem:[%s799_s24 + $0x10] sm:$0xff]  ;;  %s364_s12 = smul.u32 1536, %s613_s13  ;;  %s260_s13 = sshll.u32 %s808_s29, 4  ;;  %s863_s13 = int_to_ptr.vmem [resolvable:$true] %s260_s13 }
  0x50   : > { %v186_v4 = vmul.f32 %v174_v1, %v174_v1  ;;  %v187_v5 = vmul.f32 %v175_v3, %v175_v3  ;;  %v188_v9 = vmul.f32 %v176_v7, %v176_v7  ;;  %v177_v10 = vld [vmem:[%s799_s24 + $0x18] sm:$0xff]  ;;  %v178_v12 = vld [vmem:[%s799_s24 + $0x20] sm:$0xff]  ;;  %v179_v18 = vld [vmem:[%s799_s24 + $0x28] sm:$0xff]  ;;  %s870_s30 = scalar_lea.sflag [#allocation4], %s150_s18  ;;  %s503_s27 = scalar_lea.vmem %s863_s13, 1536 }
  0x51   : > { %v210_v2 = vld [vmem:[%s808_s29] sm:$0xff]  ;;  %v211_v6 = vld [vmem:[%s808_s29 + $0x8] sm:$0xff]  ;;  %v189_v15 = vmul.f32 %v177_v10, %v177_v10  ;;  %v190_v16 = vmul.f32 %v178_v12, %v178_v12  ;;  %v191_v21 = vmul.f32 %v179_v18, %v179_v18  ;;  %v180_v22 = vld [vmem:[%s799_s24 + $0x30] sm:$0xff]  ;;  %s860_s17 = scalar_lea.hbm %s932_s1, %s364_s12  ;;  %p504_p7 = scmp.ne.s32.totalorder %s863_s13, %s503_s27 }
  0x52   : > { %v212_v8 = vld [vmem:[%s808_s29 + $0x10] sm:$0xff]  ;;  %v213_v11 = vld [vmem:[%s808_s29 + $0x18] sm:$0xff]  ;;  %v222_v13 = vadd.f32 %v210_v2, %v186_v4  ;;  %v223_v14 = vadd.f32 %v211_v6, %v187_v5  ;;  %v192_v27 = vmul.f32 %v180_v22, %v180_v22  ;;  %v182_v30 = vld [vmem:[%s799_s24 + $0x40] sm:$0xff]  ;;  %p940_p2 = scmp.ne.s32.totalorder %s936_s4, 0  ;;  %s632_s26 = smov [#allocation5]  }
  0x53   : > { %v214_v17 = vld [vmem:[%s808_s29 + $0x20] sm:$0xff]  ;;  %v215_v19 = vld [vmem:[%s808_s29 + $0x28] sm:$0xff]  ;;  %v224_v20 = vadd.f32 %v212_v8, %v188_v9  ;;  %v181_v24 = vld [vmem:[%s799_s24 + $0x38] sm:$0xff]  ;;  %v225_v25 = vadd.f32 %v213_v11, %v189_v15  ;;  %v194_v33 = vmul.f32 %v182_v30, %v182_v30  ;;  %s507_s21 = sshll.u32 %s632_s26, 4  ;;  %s508_s21 = int_to_ptr.vmem [resolvable:$false] %s507_s21 }
  0x54   : > { %v216_v23 = vld [vmem:[%s808_s29 + $0x30] sm:$0xff]  ;;  %234 = vst [vmem:[%s808_s29] sm:$0xff] %v222_v13  ;;  %235 = vst [vmem:[%s808_s29 + $0x8] sm:$0xff] %v223_v14  ;;  %v226_v26 = vadd.f32 %v214_v17, %v190_v16  ;;  %v193_v28 = vmul.f32 %v181_v24, %v181_v24  ;;  %v217_v29 = vld [vmem:[%s808_s29 + $0x38] sm:$0xff]  ;;  %v227_v32 = vadd.f32 %v215_v19, %v191_v21  ;;  %p505_p3 = pnand %p504_p7, %p940_p2  ;;  %s509_s5 = scalar_lea.vmem %s508_s21, 3072 }
  0x55   : > { %v218_v31 = vld [vmem:[%s808_s29 + $0x40] sm:$0xff]  ;;  %236 = vst [vmem:[%s808_s29 + $0x10] sm:$0xff] %v224_v20  ;;  %v183_v34 = vld [vmem:[%s799_s24 + $0x48] sm:$0xff]  ;;  %v184_v36 = vld [vmem:[%s799_s24 + $0x50] sm:$0xff]  ;;  %v228_v37 = vadd.f32 %v216_v23, %v192_v27  ;;  %p510_p1 = scmp.lt.s32.totalorder %s863_s13, %s508_s21  ;;  %p511_p6 = scmp.lt.s32.totalorder %s509_s5, %s503_s27 }
  0x56   : > { %v219_v35 = vld [vmem:[%s808_s29 + $0x48] sm:$0xff]  ;;  %237 = vst [vmem:[%s808_s29 + $0x18] sm:$0xff] %v225_v25  ;;  %238 = vst [vmem:[%s808_s29 + $0x20] sm:$0xff] %v226_v26  ;;  %v229_v38 = vadd.f32 %v217_v29, %v193_v28  ;;  %v195_v39 = vmul.f32 %v183_v34, %v183_v34  ;;  %v196_v40 = vmul.f32 %v184_v36, %v184_v36  ;;  %v220_v41 = vld [vmem:[%s808_s29 + $0x50] sm:$0xff]  ;;  %p506_p0 = pneg %p505_p3 }
  0x57   : > { %v185_v42 = vld [vmem:[%s799_s24 + $0x58] sm:$0xff]  ;;  %239 = vst [vmem:[%s808_s29 + $0x28] sm:$0xff] %v227_v32  ;;  %v230_v44 = vadd.f32 %v218_v31, %v194_v33  ;;  %240 = vst [vmem:[%s808_s29 + $0x30] sm:$0xff] %v228_v37  ;;  %p512_p9 = por %p511_p6, %p510_p1 }
  0x58   : > { %v221_v43 = vld [vmem:[%s808_s29 + $0x58] sm:$0xff]  ;;  %v197_v45 = vmul.f32 %v185_v42, %v185_v42  ;;  %241 = vst [vmem:[%s808_s29 + $0x38] sm:$0xff] %v229_v38  ;;  %v231_v46 = vadd.f32 %v219_v35, %v195_v39  ;;  %v232_v47 = vadd.f32 %v220_v41, %v196_v40 }
  0x59   : > { %242 = vst [vmem:[%s808_s29 + $0x40] sm:$0xff] %v230_v44  ;;  %p513_p10 = pnand %p512_p9, %p506_p0 }
  0x5a   : > { %v233_v48 = vadd.f32 %v221_v43, %v197_v45  ;;  %243 = vst [vmem:[%s808_s29 + $0x48] sm:$0xff] %v231_v46  ;;  %244 = vst [vmem:[%s808_s29 + $0x50] sm:$0xff] %v232_v47 }
  0x5c   : > { %245 = vst [vmem:[%s808_s29 + $0x58] sm:$0xff] %v233_v48 }
  0x5d   : > { %516 = shalt.err (!%p513_p10)
}
  0x5e   : > { %s517_s28 = scalar_lea.hbm %s860_s17, 1536  ;;  %s521_s23 = scalar_lea.hbm %s932_s1, 3072 }
  0x5f   : > { %p518_p11 = scmp.ne.s32.totalorder %s860_s17, %s517_s28  ;;  %p522_p8 = scmp.lt.u32.totalorder %s860_s17, %s932_s1 }
  0x60   : > { %p523_p5 = scmp.lt.u32.totalorder %s521_s23, %s517_s28  ;;  %p525_p7 = scmp.lt.u32.totalorder %s517_s28, %s860_s17 }
  0x61   : > { %p519_p13 = pnand %p518_p11, %p940_p2 }
  0x62   : > { %p524_p12 = por %p523_p5, %p522_p8 }
  0x63   : > { %p520_p4 = pneg %p519_p13 }
  0x64   : > { %p526_p3 = por %p525_p7, %p524_p12 }
  0x66   : > { %p527_p0 = pnand %p526_p3, %p520_p4 }
  0x68   : > { %530 = shalt.err (!%p527_p0)
}
  0x69   : > { %s633_s25 = smov 512   ;;  %s634_s22 = smov 32  }
  0x6a   : > { %367 = dma.vmem_to_hbm [thread:$0]  (%p940_p2), %s863_s13, 1536, %s860_s17, %s870_s30, %s633_s25, %s633_s25, %s634_s22  }
  0x6b PF: > { %p378_p1 = scmp.ge.s32.totalorder %s625_s16, 2  ;;  %s275_s27 = sand.u32 1, %s585_s6  }
  0x6c   : > { %p941_p6 = scmp.ne.s32.totalorder %s937_s9, 0  ;;  %s276_s26 = scalar_lea.sflag [#allocation4], %s275_s27 }
  0x6e   : > { %p374_p9 = pnand %p378_p1, %p941_p6 }
  0x70   : > { %580 = dma.done.wait (!%p374_p9), %s276_s26, 1536  }
  0x71   : > { %582 = vsyncadd (!%p374_p9), %s276_s26, 4294965760  ;;  %s17_s16 = sadd.s32 1, %s625_s16   ;;  %s942_s6 = smov %s589_s7 }
  0x72   : > { %p14_p10 = scmp.ge.s32.totalorder %s17_s16, 6   ;;  %s943_s7 = smov %s593_s8 }
  0x73   : > { %s944_s8 = smov %s733_s2  ;;  %s945_s9 = smov %s601_s10 }
  0x74   : > { %s946_s10 = smov %s605_s11  ;;  %s947_s11 = smov %s736_s3 }
  0x75   : > { %s948_s12 = smov %s617_s14  ;;  %s949_s13 = smov %s621_s15 }
  0x76   : > { %s950_s14 = smov %s953_s19  ;;  %s951_s15 = smov %s957_s20 }
  0x77   :  { %16 = sbr.rel (!%p14_p10) target bundleno = 9 (0x9), region = 74 }
  0x7e   :  { %281 = vsyncpa [#allocation3], 1 }
  0x7f   :  { %283 = vsyncpa [#allocation3 + $0x1], 1 }
  0x80   :  { %284 = vsyncpa [#allocation4], 1 }
  0x81   :  { %286 = vsyncpa [#allocation4 + $0x1], 1 }

</bundles_post_ra>
